<compile_context>
chip_gen: v6e
topology: v6e:2x2x1
jax: 0.10.0
libtpu: 0.0.40
codegen_flags: <defaults>
</compile_context>

<pallas_src>
import functools

import jax
import jax.numpy as jnp
from jax.experimental import pallas as pl
from jax.experimental.pallas import tpu as pltpu

K_IN = 17 * 3      # 51   (nn.Linear in_features)
N_OUT = 1408       # 11 * 128 -> lane-dense output, unmasked vst


def _round_up(n, m):
    return ((n + m - 1) // m) * m


def _linear_kernel(x_ref, w_ref, b_ref, o_ref, *, compute_dtype):
    # x_ref: (TM, 51)    batch tile of the flattened input (native dtype)
    # w_ref: (51, 1408)  weight, resident across the grid (compute dtype)
    # b_ref: (1, 1408)   bias (f32)
    # o_ref: (TM, 1408)
    x = x_ref[...].astype(compute_dtype)
    acc = jnp.dot(x, w_ref[...], preferred_element_type=jnp.float32)
    o_ref[...] = (acc + b_ref[...]).astype(o_ref.dtype)


def prepare_params(w_t, b, compute_dtype=jnp.float32):
    """One-time parameter prep (do NOT call per forward).

    w_t: (51, 1408) weight already laid out (in_features, out_features);
         transpose here once if coming from PyTorch's (out, in) layout.
    b:   (1408,)
    """
    w_prep = jnp.asarray(w_t, dtype=compute_dtype)            # (51, 1408)
    b_prep = jnp.asarray(b, dtype=jnp.float32).reshape(1, N_OUT)
    return w_prep, b_prep


@functools.partial(
    jax.jit, static_argnames=("compute_dtype", "out_dtype", "batch_tile"))
def motionnet_forward(x, w_prep, b_prep, *, compute_dtype=jnp.float32,
                      out_dtype=None, batch_tile=1024):
    """x: (B, 17, 3) -> (B, 1408).  w_prep/b_prep come from prepare_params()."""
    B = x.shape[0]
    x_flat = x.reshape(B, K_IN)                     # == torch.flatten(x, 1)
    out_dtype = jnp.dtype(x.dtype) if out_dtype is None else jnp.dtype(out_dtype)

    # Sublane rounding: 16 when any 16-bit dtype is in play, else 8.
    any16 = min(jnp.dtype(x.dtype).itemsize,
                jnp.dtype(compute_dtype).itemsize,
                jnp.dtype(out_dtype).itemsize) == 2
    sublane = 16 if any16 else 8

    batch_tile = max(sublane, (int(batch_tile) // sublane) * sublane)
    if B <= sublane:
        tm = sublane
    else:
        # Guarantee >= 2 grid steps (v7x megacore sharding of the "parallel"
        # batch axis), capped by batch_tile for VMEM / pipelining.
        tm = min(batch_tile, _round_up(pl.cdiv(B, 2), sublane))
    grid_b = pl.cdiv(B, tm)     # final block may be partial -> masked store

    # Explicit scoped-VMEM budget (v5e defaults to 16 MiB). Per-step footprint
    # is dominated by the double-buffered output tile.
    need = (2 * tm * N_OUT * jnp.dtype(out_dtype).itemsize
            + 2 * tm * K_IN * jnp.dtype(x.dtype).itemsize
            + 2 * K_IN * N_OUT * jnp.dtype(compute_dtype).itemsize
            + 2 * N_OUT * 4
            + (8 << 20))                                   # compiler headroom
    vmem_limit_bytes = int(min(max(need, 32 << 20), 48 << 20))

    cost = pl.CostEstimate(
        flops=2 * B * K_IN * N_OUT,
        transcendentals=0,
        bytes_accessed=(B * K_IN * jnp.dtype(x.dtype).itemsize
                        + K_IN * N_OUT * jnp.dtype(compute_dtype).itemsize
                        + N_OUT * 4
                        + B * N_OUT * jnp.dtype(out_dtype).itemsize),
    )

    kernel = functools.partial(_linear_kernel, compute_dtype=compute_dtype)

    return pl.pallas_call(
        kernel,
        out_shape=jax.ShapeDtypeStruct((B, N_OUT), out_dtype),
        grid_spec=pltpu.PrefetchScalarGridSpec(
            num_scalar_prefetch=0,
            grid=(grid_b,),
            in_specs=[
                pl.BlockSpec((tm, K_IN), lambda i: (i, 0)),     # x batch tile
                pl.BlockSpec((K_IN, N_OUT), lambda i: (0, 0)),  # W resident
                pl.BlockSpec((1, N_OUT), lambda i: (0, 0)),     # bias resident
            ],
            out_specs=pl.BlockSpec((tm, N_OUT), lambda i: (i, 0)),
        ),
        compiler_params=pltpu.CompilerParams(
            dimension_semantics=("parallel",),
            vmem_limit_bytes=vmem_limit_bytes,
        ),
        cost_estimate=cost,
    )(x_flat, w_prep, b_prep)


def init_params(key):
    """Deterministic init mimicking PyTorch nn.Linear default U[-1/sqrt(k), 1/sqrt(k)]."""
    kw, kb = jax.random.split(key)
    bound = 1.0 / (K_IN ** 0.5)
    # Stored already transposed: (in_features, out_features).
    w_t = jax.random.uniform(
        kw, (K_IN, N_OUT), jnp.float32, minval=-bound, maxval=bound)
    b = jax.random.uniform(
        kb, (N_OUT,), jnp.float32, minval=-bound, maxval=bound)
    return w_t, b


if __name__ == "__main__":
    key = jax.random.PRNGKey(0)
    kx, kp = jax.random.split(key)

    w_t, b = init_params(kp)

    # --- f32 path: params prepared once, single (partial) batch block. ---
    w_prep, b_prep = prepare_params(w_t, b)
    B = 2
    x = jax.random.normal(kx, (B, 17, 3), jnp.float32)   # keypoint-style input
    y = motionnet_forward(x, w_prep, b_prep)
    jax.block_until_ready(y)
    y_ref = x.reshape(B, K_IN) @ w_t + b
    assert y.shape == (B, N_OUT)
    assert jnp.allclose(y, y_ref, atol=1e-5, rtol=1e-5), "f32 single-block mismatch"

    # --- Batch-tiled path: grid of 3 steps, masked partial final block. ---
    B2 = 20
    x2 = jax.random.normal(jax.random.PRNGKey(1), (B2, 17, 3), jnp.float32)
    y2 = motionnet_forward(x2, w_prep, b_prep, batch_tile=8)
    jax.block_until_ready(y2)
    y2_ref = x2.reshape(B2, K_IN) @ w_t + b
    assert y2.shape == (B2, N_OUT)
    assert jnp.allclose(y2, y2_ref, atol=1e-5, rtol=1e-5), "f32 batch-tiled mismatch"

    # --- bf16 compute path: bf16-resident weight, in-kernel cast of x, f32 acc/out. ---
    w_prep_bf16, b_prep_bf16 = prepare_params(w_t, b, compute_dtype=jnp.bfloat16)
    y3 = motionnet_forward(x, w_prep_bf16, b_prep_bf16, compute_dtype=jnp.bfloat16)
    jax.block_until_ready(y3)
    assert jnp.allclose(y3, y_ref, atol=3e-2, rtol=3e-2), "bf16 path mismatch"

    print("KERNEL_OK")
</pallas_src>

<mosaic_0001>
module attributes {stable_mosaic.version = 11 : i64} {
  func.func @_linear_kernel(%arg0: i32, %arg1: memref<8x51xf32, #tpu.memory_space<vmem>>, %arg2: memref<51x1408xf32, #tpu.memory_space<vmem>>, %arg3: memref<1x1408xf32, #tpu.memory_space<vmem>>, %arg4: memref<8x1408xf32, #tpu.memory_space<vmem>>) attributes {dimension_semantics = [#tpu.dimension_semantics<parallel>], iteration_bounds = array<i64: 1>, scalar_prefetch = 0 : i64, scratch_operands = 0 : i64, tpu.core_type = #tpu.core_type<tc>, window_params = [{transform_indices = @transform_0, window_bounds = array<i64: 8, 51>}, {pipeline_mode = #tpu.pipeline_mode<synchronous>, transform_indices = @transform_1, window_bounds = array<i64: 51, 1408>}, {pipeline_mode = #tpu.pipeline_mode<synchronous>, transform_indices = @transform_2, window_bounds = array<i64: 1, 1408>}, {transform_indices = @transform_3, window_bounds = array<i64: 8, 1408>}]} {
    %c0 = arith.constant 0 : index
    %c0_0 = arith.constant 0 : index
    %0 = vector.load %arg1[%c0, %c0_0] : memref<8x51xf32, #tpu.memory_space<vmem>>, vector<8x51xf32>
    %c0_1 = arith.constant 0 : index
    %c0_2 = arith.constant 0 : index
    %1 = vector.load %arg2[%c0_1, %c0_2] : memref<51x1408xf32, #tpu.memory_space<vmem>>, vector<51x1408xf32>
    %cst = arith.constant dense<0.000000e+00> : vector<8x1408xf32>
    %2 = tpu.matmul %0, %1, %cst {dimension_numbers = #tpu.dot_dimension_numbers<[1], [0], [0], [1], [0, 0, 1, 1], [], []>} : vector<8x51xf32>, vector<51x1408xf32>, vector<8x1408xf32> -> vector<8x1408xf32>
    %c0_3 = arith.constant 0 : index
    %c0_4 = arith.constant 0 : index
    %3 = vector.load %arg3[%c0_3, %c0_4] : memref<1x1408xf32, #tpu.memory_space<vmem>>, vector<1x1408xf32>
    %4 = vector.broadcast %3 : vector<1x1408xf32> to vector<8x1408xf32>
    %5 = arith.addf %2, %4 : vector<8x1408xf32>
    %c0_5 = arith.constant 0 : index
    %c0_6 = arith.constant 0 : index
    %6 = vector.load %arg4[%c0_5, %c0_6] : memref<8x1408xf32, #tpu.memory_space<vmem>>, vector<8x1408xf32>
    tpu.vector_store %arg4[%c0_5, %c0_6], %5 {strides = array<i32>} : memref<8x1408xf32, #tpu.memory_space<vmem>>, vector<8x1408xf32>,
    return
  }
  func.func @transform_0(%arg0: i32) -> (i32, i32) {
    %c0_i32 = arith.constant 0 : i32
    %c0_i32_0 = arith.constant 0 : i32
    return %arg0, %c0_i32 : i32, i32
  }
  func.func @transform_1(%arg0: i32) -> (i32, i32) {
    %c0_i32 = arith.constant 0 : i32
    %c0_i32_0 = arith.constant 0 : i32
    %c0_i32_1 = arith.constant 0 : i32
    return %c0_i32, %c0_i32_0 : i32, i32
  }
  func.func @transform_2(%arg0: i32) -> (i32, i32) {
    %c0_i32 = arith.constant 0 : i32
    %c0_i32_0 = arith.constant 0 : i32
    %c0_i32_1 = arith.constant 0 : i32
    return %c0_i32, %c0_i32_0 : i32, i32
  }
  func.func @transform_3(%arg0: i32) -> (i32, i32) {
    %c0_i32 = arith.constant 0 : i32
    %c0_i32_0 = arith.constant 0 : i32
    return %arg0, %c0_i32 : i32, i32
  }
}

</mosaic_0001>

<bundles_post_ra>
// kernel: motionnet_forward.1
= control target key start
LH: loop header
LB: loop body
LE: loop exit
PB: predicated region body
PF: predicated region fallthrough
CT: control target
= control target key end

     0   :  { %8 = vsyncpa [#allocation3], 0  ;;  %s1002_s0 = inlined_call_operand.vmem [shape: f32[2,51], index: 0, kind: input, shape index: {}]   ;;  %s1003_s1 = inlined_call_operand.hbm [shape: f32[51,1408], index: 1, kind: input, shape index: {}]   ;;  %s1004_s2 = inlined_call_operand.vmem [shape: f32[1,1408], index: 2, kind: input, shape index: {}]   ;;  %s1005_s3 = inlined_call_operand.hbm [shape: f32[2,1408], index: 3, kind: output, shape index: {}]  }
   0x1   :  { %9 = vsyncpa [#allocation4], 0  ;;  %s883_s12 = smov [#allocation2]  }
   0x2   :  { %s17_s13 = sshll.u32 %s883_s12, 4  ;;  %s18_s13 = int_to_ptr.vmem [resolvable:$true] %s17_s13 }
   0x3   :  { %s847_s14 = scalar_lea.vmem %s18_s13, 9856  ;;  %p852_p1 = scmp.lt.s32.totalorder %s18_s13, %s18_s13 }
   0x4   :  { %p848_p0 = scmp.ne.s32.totalorder %s18_s13, %s847_s14  ;;  %p853_p2 = scmp.lt.s32.totalorder %s847_s14, %s847_s14 }
   0x6   :  { %p854_p3 = por %p853_p2, %p852_p1 }
   0x8   :  { %p855_p4 = pnand %p854_p3, %p848_p0 }
   0xa   :  { %858 = shalt.err (!%p855_p4)
}
   0xb   :  { %s884_s15 = smov 1408   ;;  %s885_s16 = smov 88  }
   0xc   :  { %23 = dma.hbm_to_vmem [thread:$0]  %s1003_s1, 9856, %s18_s13, [#allocation3], %s884_s15, %s884_s15, %s885_s16  }
   0xd   :  { %879 = dma.done.wait [#allocation3], 9856  }
   0xe   :  { %880 = vsyncadd [#allocation3], 4294957440  ;;  %v886_v0 = vmov 0.0   ;;  %vm170_vm0 = vcmask 1042432   ;;  %v97_v1 = vld [vmem:[#allocation2 + $0x218] sm:$0x7] }
   0xf   :  { %268 = vmatprep.mubr.f32.mxu0 %v886_v0  ;;  %339 = vmatprep.mubr.f32.mxu1 %v886_v0  ;;  %v99_v2 = vld [vmem:[#allocation2 + $0x228] sm:$0x7]  ;;  %v96_v3 = vld [vmem:[#allocation2 + $0x210] sm:$0x7]  ;;  %v98_v4 = vld [vmem:[#allocation2 + $0x220] sm:$0x7] }
  0x10   :  { %788 = vmatprep.subr.msk.mxu0 %vm170_vm0, %v97_v1  ;;  %791 = vmatprep.subr.msk.mxu1 %vm170_vm0, %v99_v2  ;;  %v86_v5 = vld [vmem:[#allocation2 + $0x1c0] sm:$0xff]  ;;  %v88_v6 = vld [vmem:[#allocation2 + $0x1d0] sm:$0xff]  ;;  %v85_v7 = vld [vmem:[#allocation2 + $0x1b8] sm:$0xff]  ;;  %vm166_vm1 = vcmask 416768   ;;  %vm887_vm2 = vmmov 0  }
  0x11   :  { %789 = vmatpush1.msk.msra.mxu0 %vm170_vm0, %v96_v3  ;;  %792 = vmatpush1.msk.msra.mxu1 %vm170_vm0, %v98_v4  ;;  %v87_v8 = vld [vmem:[#allocation2 + $0x1c8] sm:$0xff]  ;;  %v77_v10 = vld [vmem:[#allocation2 + $0x178] sm:$0xff]  ;;  %v74_v11 = vld [vmem:[#allocation2 + $0x160] sm:$0xff] }
  0x12   :  { %v75_v9 = vld [vmem:[#allocation2 + $0x168] sm:$0xff]  ;;  %224 = vmatprep.subr.mxu0 %v86_v5  ;;  %295 = vmatprep.subr.mxu1 %v88_v6  ;;  %v76_v12 = vld [vmem:[#allocation2 + $0x170] sm:$0xff]  ;;  %v66_v14 = vld [vmem:[#allocation2 + $0x120] sm:$0xff] }
  0x13   :  { %225 = vmatpush1.msra.mxu0 %v85_v7  ;;  %296 = vmatpush1.msra.mxu1 %v87_v8  ;;  %v64_v13 = vld [vmem:[#allocation2 + $0x110] sm:$0xff]  ;;  %v63_v15 = vld [vmem:[#allocation2 + $0x108] sm:$0xff]  ;;  %v65_v16 = vld [vmem:[#allocation2 + $0x118] sm:$0xff] }
  0x14   :  { %226 = vmatprep.subr.mxu0 %v75_v9  ;;  %297 = vmatprep.subr.mxu1 %v77_v10  ;;  %v53_v17 = vld [vmem:[#allocation2 + $0xb8] sm:$0xff]  ;;  %v55_v18 = vld [vmem:[#allocation2 + $0xc8] sm:$0xff]  ;;  %v52_v19 = vld [vmem:[#allocation2 + $0xb0] sm:$0xff] }
  0x15   :  { %227 = vmatpush1.msra.mxu0 %v74_v11  ;;  %298 = vmatpush1.msra.mxu1 %v76_v12  ;;  %v54_v20 = vld [vmem:[#allocation2 + $0xc0] sm:$0xff]  ;;  %v44_v22 = vld [vmem:[#allocation2 + $0x70] sm:$0xff]  ;;  %v41_v23 = vld [vmem:[#allocation2 + $0x58] sm:$0xff] }
  0x16   :  { %228 = vmatprep.subr.mxu0 %v64_v13  ;;  %299 = vmatprep.subr.mxu1 %v66_v14  ;;  %v42_v21 = vld [vmem:[#allocation2 + $0x60] sm:$0xff]  ;;  %v43_v24 = vld [vmem:[#allocation2 + $0x68] sm:$0xff]  ;;  %v33_v26 = vld [vmem:[#allocation2 + $0x18] sm:$0xff] }
  0x17   :  { %229 = vmatpush1.msra.mxu0 %v63_v15  ;;  %300 = vmatpush1.msra.mxu1 %v65_v16  ;;  %v31_v25 = vld [vmem:[#allocation2 + $0x8] sm:$0xff]  ;;  %v30_v27 = vld [vmem:[#allocation2] sm:$0xff]  ;;  %v32_v28 = vld [vmem:[#allocation2 + $0x10] sm:$0xff]  ;;  %v111_v16 = vlaneseq }
  0x18   :  { %230 = vmatprep.subr.mxu0 %v53_v17  ;;  %301 = vmatprep.subr.mxu1 %v55_v18  ;;  %v924_v29 = vld [vmem:[%s1002_s0] sm:$0xff]  ;;  %v101_v30 = vld [vmem:[#allocation2 + $0x238] sm:$0x7]  ;;  %v103_v31 = vld [vmem:[#allocation2 + $0x248] sm:$0x7] }
  0x19   :  { %231 = vmatpush1.msra.mxu0 %v52_v19  ;;  %302 = vmatpush1.msra.mxu1 %v54_v20  ;;  %v100_v32 = vld [vmem:[#allocation2 + $0x230] sm:$0x7]  ;;  %v102_v33 = vld [vmem:[#allocation2 + $0x240] sm:$0x7]  ;;  %v89_v36 = vld [vmem:[#allocation2 + $0x1d8] sm:$0xff]  ;;  %v956_v17 = vshrl.u32 %v111_v16, 7 }
  0x1a   :  { %232 = vmatprep.subr.mxu0 %v42_v21  ;;  %303 = vmatprep.subr.mxu1 %v44_v22  ;;  %v90_v34 = vld [vmem:[#allocation2 + $0x1e0] sm:$0xff]  ;;  %v92_v35 = vld [vmem:[#allocation2 + $0x1f0] sm:$0xff]  ;;  %v91_v37 = vld [vmem:[#allocation2 + $0x1e8] sm:$0xff] }
  0x1b   :  { %233 = vmatpush1.msra.mxu0 %v41_v23  ;;  %304 = vmatpush1.msra.mxu1 %v43_v24  ;;  %v79_v38 = vld [vmem:[#allocation2 + $0x188] sm:$0xff]  ;;  %v81_v39 = vld [vmem:[#allocation2 + $0x198] sm:$0xff]  ;;  %v78_v40 = vld [vmem:[#allocation2 + $0x180] sm:$0xff]  ;;  %v113_v18 = vsub.s32 0, %v956_v17  ;;  %v121_v19 = vsub.s32 2, %v956_v17  ;;  %v117_v21 = vsub.s32 1, %v956_v17 }
  0x1c   :  { %234 = vmatprep.subr.mxu0 %v31_v25  ;;  %305 = vmatprep.subr.mxu1 %v33_v26  ;;  %v80_v41 = vld [vmem:[#allocation2 + $0x190] sm:$0xff]  ;;  %v70_v43 = vld [vmem:[#allocation2 + $0x140] sm:$0xff]  ;;  %v67_v44 = vld [vmem:[#allocation2 + $0x128] sm:$0xff]  ;;  %v125_v23 = vsub.s32 3, %v956_v17 }
  0x1d   :  { %235 = vmatpush1.msra.mxu0 %v30_v27  ;;  %306 = vmatpush1.msra.mxu1 %v32_v28  ;;  %v68_v42 = vld [vmem:[#allocation2 + $0x130] sm:$0xff]  ;;  %v69_v45 = vld [vmem:[#allocation2 + $0x138] sm:$0xff]  ;;  %v59_v47 = vld [vmem:[#allocation2 + $0xe8] sm:$0xff] }
  0x1e   :  { %790 = vmatmul.mubr.msk.f32.vlgmr.msra.gmra.mxu0 %vm166_vm1, %v924_v29  ;;  %793 = vmatmul.mubr.msk.f32.vlgmr.msra.gmra.mxu1 %vm166_vm1, %v924_v29  ;;  %v57_v46 = vld [vmem:[#allocation2 + $0xd8] sm:$0xff]  ;;  %v56_v48 = vld [vmem:[#allocation2 + $0xd0] sm:$0xff]  ;;  %v58_v49 = vld [vmem:[#allocation2 + $0xe0] sm:$0xff] }
  0x1f   :  { %794 = vmatprep.subr.msk.mxu0 %vm170_vm0, %v101_v30  ;;  %797 = vmatprep.subr.msk.mxu1 %vm170_vm0, %v103_v31  ;;  %v46_v50 = vld [vmem:[#allocation2 + $0x80] sm:$0xff]  ;;  %v48_v51 = vld [vmem:[#allocation2 + $0x90] sm:$0xff]  ;;  %v45_v52 = vld [vmem:[#allocation2 + $0x78] sm:$0xff] }
  0x20   :  { %795 = vmatpush1.msk.msra.mxu0 %vm170_vm0, %v100_v32  ;;  %798 = vmatpush1.msk.msra.mxu1 %vm170_vm0, %v102_v33  ;;  %v47_v53 = vld [vmem:[#allocation2 + $0x88] sm:$0xff]  ;;  %v37_v55 = vld [vmem:[#allocation2 + $0x38] sm:$0xff]  ;;  %v34_v56 = vld [vmem:[#allocation2 + $0x20] sm:$0xff] }
  0x21   :  { %366 = vmatprep.subr.mxu0 %v90_v34  ;;  %437 = vmatprep.subr.mxu1 %v92_v35  ;;  %v35_v54 = vld [vmem:[#allocation2 + $0x28] sm:$0xff]  ;;  %v36_v57 = vld [vmem:[#allocation2 + $0x30] sm:$0xff]  ;;  %v105_v58 = vld [vmem:[#allocation2 + $0x258] sm:$0x7] }
  0x22   :  { %367 = vmatpush1.msra.mxu0 %v89_v36  ;;  %438 = vmatpush1.msra.mxu1 %v91_v37  ;;  %v104_v59 = vld [vmem:[#allocation2 + $0x250] sm:$0x7]  ;;  %v106_v60 = vld [vmem:[#allocation2 + $0x260] sm:$0x7]  ;;  %v93_v62 = vld [vmem:[#allocation2 + $0x1f8] sm:$0xff] }
  0x23   :  { %368 = vmatprep.subr.mxu0 %v79_v38  ;;  %439 = vmatprep.subr.mxu1 %v81_v39  ;;  %v94_v61 = vld [vmem:[#allocation2 + $0x200] sm:$0xff]  ;;  %v95_v63 = vld [vmem:[#allocation2 + $0x208] sm:$0xff]  ;;  %v84_v3 = vld [vmem:[#allocation2 + $0x1b0] sm:$0xff] }
  0x24   :  { %369 = vmatpush1.msra.mxu0 %v78_v40  ;;  %440 = vmatpush1.msra.mxu1 %v80_v41  ;;  %v83_v1 = vld [vmem:[#allocation2 + $0x1a8] sm:$0xff]  ;;  %v82_v2 = vld [vmem:[#allocation2 + $0x1a0] sm:$0xff]  ;;  %v72_v4 = vld [vmem:[#allocation2 + $0x150] sm:$0xff] }
  0x25   :  { %370 = vmatprep.subr.mxu0 %v68_v42  ;;  %441 = vmatprep.subr.mxu1 %v70_v43  ;;  %v71_v5 = vld [vmem:[#allocation2 + $0x148] sm:$0xff]  ;;  %v73_v6 = vld [vmem:[#allocation2 + $0x158] sm:$0xff]  ;;  %v60_v8 = vld [vmem:[#allocation2 + $0xf0] sm:$0xff] }
  0x26   :  { %371 = vmatpush1.msra.mxu0 %v67_v44  ;;  %442 = vmatpush1.msra.mxu1 %v69_v45  ;;  %v61_v7 = vld [vmem:[#allocation2 + $0xf8] sm:$0xff]  ;;  %v62_v9 = vld [vmem:[#allocation2 + $0x100] sm:$0xff]  ;;  %v51_v12 = vld [vmem:[#allocation2 + $0xa8] sm:$0xff] }
  0x27   :  { %372 = vmatprep.subr.mxu0 %v57_v46  ;;  %443 = vmatprep.subr.mxu1 %v59_v47  ;;  %v50_v10 = vld [vmem:[#allocation2 + $0xa0] sm:$0xff]  ;;  %v49_v11 = vld [vmem:[#allocation2 + $0x98] sm:$0xff]  ;;  %v39_v13 = vld [vmem:[#allocation2 + $0x48] sm:$0xff]  ;;  %v129_v46 = vsub.s32 4, %v956_v17  ;;  %v137_v47 = vsub.s32 6, %v956_v17 }
  0x28   :  { %373 = vmatpush1.msra.mxu0 %v56_v48  ;;  %444 = vmatpush1.msra.mxu1 %v58_v49  ;;  %v38_v14 = vld [vmem:[#allocation2 + $0x40] sm:$0xff]  ;;  %v40_v15 = vld [vmem:[#allocation2 + $0x50] sm:$0xff] }
  0x29   :  { %374 = vmatprep.subr.mxu0 %v46_v50  ;;  %445 = vmatprep.subr.mxu1 %v48_v51  ;;  %v107_v20 = vld [vmem:[%s1004_s2] sm:$0xff] }
  0x2a   :  { %375 = vmatpush1.msra.mxu0 %v45_v52  ;;  %446 = vmatpush1.msra.mxu1 %v47_v53  ;;  %v114_v24 = vrot.slane %v107_v20, %v113_v18  ;;  %v122_v25 = vrot.slane %v107_v20, %v121_v19  ;;  %v118_v26 = vrot.slane %v107_v20, %v117_v21  ;;  %v133_v52 = vsub.s32 5, %v956_v17 }
  0x2b   :  { %376 = vmatprep.subr.mxu0 %v35_v54  ;;  %447 = vmatprep.subr.mxu1 %v37_v55  ;;  %v126_v28 = vrot.slane %v107_v20, %v125_v23  ;;  %v141_v53 = vsub.s32 7, %v956_v17  ;;  %v130_v54 = vrot.slane %v107_v20, %v129_v46  ;;  %v138_v55 = vrot.slane %v107_v20, %v137_v47 }
  0x2c   :  { %377 = vmatpush1.msra.mxu0 %v34_v56  ;;  %410 = vmatprep.mubr.f32.mxu0 %v886_v0  ;;  %v134_v56 = vrot.slane %v107_v20, %v133_v52 }
  0x2d   :  { %448 = vmatpush1.msra.mxu1 %v36_v57  ;;  %481 = vmatprep.mubr.f32.mxu1 %v886_v0  ;;  %v142_v57 = vrot.slane %v107_v20, %v141_v53 }
  0x2e   :  { %796 = vmatmul.mubr.msk.f32.vlgmr.msra.gmra.mxu0 %vm166_vm1, %v924_v29  ;;  %799 = vmatmul.mubr.msk.f32.vlgmr.msra.gmra.mxu1 %vm166_vm1, %v924_v29 }
  0x2f   :  { %800 = vmatprep.subr.msk.mxu0 %vm170_vm0, %v105_v58  ;;  %813 = vmatprep.subr.mxu1 %v886_v0 }
  0x30   :  { %801 = vmatpush1.msk.msra.mxu0 %vm170_vm0, %v104_v59  ;;  %814 = vmatpush3.msk.msra.mxu1 %vm170_vm0, %v106_v60 }
  0x31   :  { %508 = vmatprep.subr.mxu0 %v94_v61  ;;  %815 = vmatprep.subr.mxu1 %v886_v0 }
  0x32   :  { %509 = vmatpush1.msra.mxu0 %v93_v62  ;;  %816 = vmatpush3.msra.mxu1 %v95_v63 }
  0x33   :  { %510 = vmatprep.subr.mxu0 %v83_v1  ;;  %817 = vmatprep.subr.mxu1 %v886_v0 }
  0x34   :  { %511 = vmatpush1.msra.mxu0 %v82_v2  ;;  %818 = vmatpush3.msra.mxu1 %v84_v3 }
  0x35   :  { %512 = vmatprep.subr.mxu0 %v72_v4  ;;  %819 = vmatprep.subr.mxu1 %v886_v0 }
  0x36   :  { %513 = vmatpush1.msra.mxu0 %v71_v5  ;;  %820 = vmatpush3.msra.mxu1 %v73_v6 }
  0x37   :  { %514 = vmatprep.subr.mxu0 %v61_v7  ;;  %821 = vmatprep.subr.mxu1 %v886_v0 }
  0x38   :  { %515 = vmatpush1.msra.mxu0 %v60_v8  ;;  %822 = vmatpush3.msra.mxu1 %v62_v9 }
  0x39   :  { %516 = vmatprep.subr.mxu0 %v50_v10  ;;  %823 = vmatprep.subr.mxu1 %v886_v0 }
  0x3a   :  { %517 = vmatpush1.msra.mxu0 %v49_v11  ;;  %824 = vmatpush3.msra.mxu1 %v51_v12 }
  0x3b   :  { %518 = vmatprep.subr.mxu0 %v39_v13  ;;  %825 = vmatprep.subr.mxu1 %v886_v0 }
  0x3c   :  { %519 = vmatpush1.msra.mxu0 %v38_v14  ;;  %552 = vmatprep.mubr.f32.mxu0 %v886_v0 }
  0x3d   :  { %826 = vmatpush3.msra.mxu1 %v40_v15  ;;  %827 = vmatprep.mubr.msk.f32.mxu1 %vm887_vm2, %v886_v0  ;;  %v888_v0 = vmov 1983009808   ;;  %v108_v15 = vld [vmem:[%s1004_s2 + $0x8] sm:$0x7] }
  0x3e   :  { %802 = vmatmul.mubr.msk.f32.vlgmr.msra.gmra.mxu0 %vm166_vm1, %v924_v29  ;;  %828 = vmatmul.mubr.msk.f32.vlgmr.msra.gmra.mxu1 %vm166_vm1, %v924_v29  ;;  %v645_v22 = vunpack.c.l.s4 %v888_v0  ;;  %v154_v16 = vrot.slane %v108_v15, %v121_v19  ;;  %v146_v20 = vrot.slane %v108_v15, %v113_v18  ;;  %v150_v0 = vrot.slane %v108_v15, %v117_v21 }
  0x40   :  { %v646_v27 = vunpack.c.0.s8 %v645_v22 }
  0x42   :  { %v972_v36 = vsub.s32 %v646_v27, %v956_v17 }
  0xde   :  { %v270_v29 = vpop.f32.mrf.mxu0  ;;  %v341_v30 = vpop.f32.mrf.mxu1 }
  0xdf   :  { %v271_v31 = vadd.f32 %v270_v29, %v114_v24  ;;  %v342_v32 = vadd.f32 %v341_v30, %v122_v25 }
  0xe0   :  { %v272_v33 = vpop.f32.mrf.mxu0  ;;  %v343_v34 = vpop.f32.mrf.mxu1 }
  0xe1   :  { %v273_v35 = vadd.f32 %v272_v33, %v118_v26  ;;  %v344_v37 = vadd.f32 %v343_v34, %v126_v28 }
  0xe3   :  { %v640_v38 = vcombine.low %v271_v31, %v273_v35  ;;  %v641_v39 = vcombine.high %v271_v31, %v273_v35  ;;  %v642_v40 = vcombine.low %v342_v32, %v344_v37  ;;  %v643_v41 = vcombine.high %v342_v32, %v344_v37 }
  0xe5   :  { %v650_v42 = vrot.slane %v640_v38, %v972_v36  ;;  %v657_v43 = vrot.slane %v641_v39, %v972_v36  ;;  %v664_v44 = vrot.slane %v642_v40, %v972_v36  ;;  %v671_v45 = vrot.slane %v643_v41, %v972_v36 }
  0xe7   :  { %v672_v48 = vcombine.low %v650_v42, %v664_v44  ;;  %v673_v49 = vcombine.high %v650_v42, %v664_v44  ;;  %v674_v50 = vcombine.low %v657_v43, %v671_v45  ;;  %v675_v51 = vcombine.high %v657_v43, %v671_v45 }
  0xe9   :  { %759 = vst [vmem:[#allocation5] sm:$0xff] %v672_v48  ;;  %762 = vst [vmem:[#allocation5 + $0x16] sm:$0xff] %v673_v49 }
  0xea   :  { %765 = vst [vmem:[#allocation5 + $0x2c] sm:$0xff] %v674_v50  ;;  %768 = vst [vmem:[#allocation5 + $0x42] sm:$0xff] %v675_v51 }
  0xee   :  { %v412_v58 = vpop.f32.mrf.mxu0  ;;  %v483_v59 = vpop.f32.mrf.mxu1 }
  0xef   :  { %v413_v60 = vadd.f32 %v412_v58, %v130_v54  ;;  %v484_v61 = vadd.f32 %v483_v59, %v138_v55 }
  0xf0   :  { %v414_v62 = vpop.f32.mrf.mxu0  ;;  %v485_v63 = vpop.f32.mrf.mxu1 }
  0xf1   :  { %v415_v1 = vadd.f32 %v414_v62, %v134_v56  ;;  %v486_v2 = vadd.f32 %v485_v63, %v142_v57 }
  0xf3   :  { %v676_v3 = vcombine.low %v413_v60, %v415_v1  ;;  %v677_v4 = vcombine.high %v413_v60, %v415_v1  ;;  %v678_v5 = vcombine.low %v484_v61, %v486_v2  ;;  %v679_v6 = vcombine.high %v484_v61, %v486_v2 }
  0xf5   :  { %v686_v7 = vrot.slane %v676_v3, %v972_v36  ;;  %v693_v8 = vrot.slane %v677_v4, %v972_v36  ;;  %v700_v9 = vrot.slane %v678_v5, %v972_v36  ;;  %v707_v10 = vrot.slane %v679_v6, %v972_v36 }
  0xf7   :  { %v708_v11 = vcombine.low %v686_v7, %v700_v9  ;;  %v709_v12 = vcombine.high %v686_v7, %v700_v9  ;;  %v710_v13 = vcombine.low %v693_v8, %v707_v10  ;;  %v711_v14 = vcombine.high %v693_v8, %v707_v10 }
  0xf9   :  { %760 = vst [vmem:[#allocation5 + $0x8] sm:$0xff] %v708_v11  ;;  %763 = vst [vmem:[#allocation5 + $0x1e] sm:$0xff] %v709_v12 }
  0xfa   :  { %766 = vst [vmem:[#allocation5 + $0x34] sm:$0xff] %v710_v13  ;;  %769 = vst [vmem:[#allocation5 + $0x4a] sm:$0xff] %v711_v14 }
  0xfe   :  { %v554_v22 = vpop.f32.mrf.mxu0  ;;  %v625_v23 = vpop.f32.mrf.mxu1 }
  0xff   :  { %v626_v24 = vadd.f32 %v625_v23, %v154_v16  ;;  %v555_v27 = vadd.f32 %v554_v22, %v146_v20 }
 0x100   :  { %v556_v25 = vpop.f32.mrf.mxu0  ;;  %v829_v26 = vpop.f32.mrf.mxu1 }
 0x101   :  { %v714_v28 = vcombine.high %v626_v24, %v626_v24  ;;  %v557_v29 = vadd.f32 %v556_v25, %v150_v0  ;;  %v735_v19 = vrot.slane %v626_v24, %v972_v36 }
 0x103   :  { %v742_v30 = vrot.slane %v714_v28, %v972_v36  ;;  %v712_v31 = vcombine.low %v555_v27, %v557_v29  ;;  %v713_v32 = vcombine.high %v555_v27, %v557_v29 }
 0x105   :  { %v721_v33 = vrot.slane %v712_v31, %v972_v36  ;;  %v728_v18 = vrot.slane %v713_v32, %v972_v36 }
 0x107   :  { %v743_v17 = vcombine.low %v721_v33, %v735_v19  ;;  %v744_v21 = vcombine.high %v721_v33, %v735_v19  ;;  %v745_v34 = vcombine.low %v728_v18, %v742_v30  ;;  %v746_v35 = vcombine.high %v728_v18, %v742_v30 }
 0x109   :  { %761 = vst [vmem:[#allocation5 + $0x10] sm:$0x3f] %v743_v17  ;;  %764 = vst [vmem:[#allocation5 + $0x26] sm:$0x3f] %v744_v21 }
 0x10a   :  { %767 = vst [vmem:[#allocation5 + $0x3c] sm:$0x3f] %v745_v34  ;;  %770 = vst [vmem:[#allocation5 + $0x52] sm:$0x3f] %v746_v35 }
 0x10b   :  { %775 = vsyncadd [#allocation4], 1056  ;;  %s889_s2 = smov [#allocation5]  }
 0x10c   :  { %s776_s23 = sshll.u32 %s889_s2, 4  ;;  %s777_s23 = int_to_ptr.vmem [resolvable:$true] %s776_s23 }
 0x10d   :  { %s859_s24 = scalar_lea.vmem %s777_s23, 352  ;;  %s863_s25 = scalar_lea.vmem %s777_s23, 1408 }
 0x10e   :  { %p860_p5 = scmp.ne.s32.totalorder %s777_s23, %s859_s24  ;;  %p864_p6 = scmp.lt.s32.totalorder %s777_s23, %s777_s23 }
 0x10f   :  { %p865_p7 = scmp.lt.s32.totalorder %s863_s25, %s859_s24 }
 0x111   :  { %p866_p8 = por %p865_p7, %p864_p6 }
 0x113   :  { %p867_p9 = pnand %p866_p8, %p860_p5 }
 0x115   :  { %870 = shalt.err (!%p867_p9)
}
 0x116   :  { %s890_s26 = smov 352   ;;  %s891_s27 = smov 22  }
 0x117   :  { %782 = dma.vmem_to_hbm [thread:$0]  %s777_s23, 352, %s1005_s3, [#allocation4], %s890_s26, %s890_s26, %s891_s27  }
 0x118   :  { %881 = dma.done.wait [#allocation4], 1408  }
 0x119   :  { %882 = vsyncadd [#allocation4], 4294965888 }
 0x11a   :  { %786 = vsyncpa [#allocation3], 1 }
 0x11b   :  { %787 = vsyncpa [#allocation4], 1 }

</bundles_post_ra>
